<compile_context>
chip_gen: v7x
topology: tpu7x:2x2x1
jax: 0.10.0
libtpu: 0.0.40
codegen_flags: <defaults>
</compile_context>

<pallas_src>
import jax
import jax.numpy as jnp
from jax import lax
from jax.experimental import pallas as pl
from jax.experimental.pallas import tpu as pltpu


# ----------------------------------------------------------------------------
# Kernel
# ----------------------------------------------------------------------------
def _disc_kernel(x_ref, w1_ref, b1_ref, w2_ref, b2_ref, w3t_ref, b3_ref, o_ref):
    # x tile arrives in f32 (no wrapper-side cast/pad pass); cast on the VPU.
    x = x_ref[...].astype(jnp.bfloat16)

    # Layer 1: Linear (bf16 MXU, f32 accumulate) + bias + LeakyReLU(0.2).
    h = jnp.dot(x, w1_ref[...], preferred_element_type=jnp.float32)
    h = h + b1_ref[...]
    h = jnp.maximum(h, 0.2 * h)

    # Layer 2: Linear + bias + LeakyReLU(0.2).
    h = jnp.dot(h.astype(jnp.bfloat16), w2_ref[...],
                preferred_element_type=jnp.float32)
    h = h + b2_ref[...]
    h = jnp.maximum(h, 0.2 * h)

    # Layer 3 in transposed form: [8, H_pad] x [TILE_B, H_pad]^T -> [8, TILE_B]
    # (row 0 of w3t holds the real weights, rows 1..7 are zero).  This keeps the
    # batch on the lane axis so the store is a lane-dense (1, TILE_B) row.
    logits = lax.dot_general(
        w3t_ref[...], h.astype(jnp.bfloat16),
        dimension_numbers=(((1,), (1,)), ((), ())),
        preferred_element_type=jnp.float32)
    logits = logits + b3_ref[...]            # (1,1) broadcasts

    o_ref[...] = logits[0:1, :].astype(o_ref.dtype)


# ----------------------------------------------------------------------------
# Host-side helpers
# ----------------------------------------------------------------------------
def _round_up(n, m):
    return ((n + m - 1) // m) * m


def _choose_tile_b(batch, max_tile=1024, align=256):
    # Big tiles amortize the ~0.35 us per-grid-step overhead; for batches big
    # enough, aim for >= 2 grid steps so the single "parallel" axis can shard
    # across both TensorCores on v7x.
    if batch <= align:
        return align
    half = -(-batch // 2)                      # cdiv(batch, 2)
    return int(min(max_tile, _round_up(half, align)))


def _vmem_limit_bytes(tile_b, d_in, h_pad):
    f32, bf16 = 4, 2
    pad8 = lambda n: _round_up(max(n, 1), 8)
    est = 0
    est += 2 * tile_b * d_in * f32                       # x tile (double-buffered)
    est += 2 * 8 * tile_b * f32                          # out row (sublane-padded)
    est += 2 * (pad8(d_in) * h_pad + h_pad * h_pad + 8 * h_pad) * bf16   # weights
    est += 2 * (2 * 8 * h_pad + 8 * 128) * f32                           # biases
    # in-kernel temporaries: h in f32+bf16 (x2 layers) and the [8, tile_b] logits
    est += tile_b * h_pad * (f32 + bf16) * 2 + 8 * tile_b * f32
    return int(min(56 * 2 ** 20, max(16 * 2 ** 20, 2 * est)))


def prepare_params(params, lane=128):
    """One-time weight prep (hoisted out of the forward hot path).

    * Casts matmul weights to bf16.
    * Zero-pads the hidden dim to a multiple of 128 so h is lane-dense (the
      padding is exactly zero through bias + LeakyReLU, so it never contributes).
    * Stores the last layer transposed and sublane-padded: [8, H_pad], row 0 real.
    """
    w1, b1, w2, b2, w3, b3 = params
    d_in, hidden = w1.shape
    h_pad = _round_up(hidden, lane)

    w1p = jnp.zeros((d_in, h_pad), jnp.bfloat16).at[:, :hidden].set(
        w1.astype(jnp.bfloat16))
    b1p = jnp.zeros((1, h_pad), jnp.float32).at[:, :hidden].set(
        jnp.reshape(b1, (1, hidden)).astype(jnp.float32))
    w2p = jnp.zeros((h_pad, h_pad), jnp.bfloat16).at[:hidden, :hidden].set(
        w2.astype(jnp.bfloat16))
    b2p = jnp.zeros((1, h_pad), jnp.float32).at[:, :hidden].set(
        jnp.reshape(b2, (1, hidden)).astype(jnp.float32))
    w3t = jnp.zeros((8, h_pad), jnp.bfloat16).at[0, :hidden].set(
        jnp.reshape(w3, (hidden,)).astype(jnp.bfloat16))
    b3p = jnp.reshape(jnp.asarray(b3, jnp.float32), (1, 1))
    return (w1p, b1p, w2p, b2p, w3t, b3p)


def discriminator_forward(x, prepared_params):
    """Matches Discriminator.forward semantics.

    x: [B, D_in] or [D_in]  (float32)
    returns: [B] (or scalar for 1-D input) -- logits with trailing dim squeezed.
    """
    w1p, b1p, w2p, b2p, w3t, b3p = prepared_params

    squeeze_batch = x.ndim == 1
    if squeeze_batch:
        x = x[None, :]                        # model(x.unsqueeze(0))[0]

    batch, d_in = x.shape
    h_pad = w1p.shape[1]

    tile_b = _choose_tile_b(batch)
    num_tiles = pl.cdiv(batch, tile_b)        # ragged tail handled by Pallas
    total = num_tiles * tile_b

    out = pl.pallas_call(
        _disc_kernel,
        out_shape=jax.ShapeDtypeStruct((1, total), jnp.float32),
        grid_spec=pltpu.PrefetchScalarGridSpec(
            num_scalar_prefetch=0,
            grid=(num_tiles,),
            in_specs=[
                # x tile marches along the batch; weights/biases use constant
                # index_maps so they stay VMEM-resident across grid steps.
                pl.BlockSpec((tile_b, d_in), lambda i: (i, 0)),
                pl.BlockSpec((d_in, h_pad), lambda i: (0, 0)),
                pl.BlockSpec((1, h_pad), lambda i: (0, 0)),
                pl.BlockSpec((h_pad, h_pad), lambda i: (0, 0)),
                pl.BlockSpec((1, h_pad), lambda i: (0, 0)),
                pl.BlockSpec((8, h_pad), lambda i: (0, 0)),
                pl.BlockSpec((1, 1), lambda i: (0, 0)),
            ],
            # Lane-dense logit row: each step writes a contiguous (1, TILE_B)
            # chunk of the single output row.
            out_specs=pl.BlockSpec((1, tile_b), lambda i: (0, i)),
        ),
        compiler_params=pltpu.CompilerParams(
            dimension_semantics=("parallel",),     # batch tiles shard across TCs
            vmem_limit_bytes=_vmem_limit_bytes(tile_b, d_in, h_pad),
        ),
    )(x, w1p, b1p, w2p, b2p, w3t, b3p)

    out = out[0, :batch]          # contiguous row slice (drops grid padding)
    if squeeze_batch:
        out = out[0]
    return out


# ----------------------------------------------------------------------------
# Synthetic params + reference
# ----------------------------------------------------------------------------
def init_params(key, d_in, hidden):
    """Deterministic synthetic init (PyTorch-default-ish uniform ranges)."""
    ks = jax.random.split(key, 6)

    def lin(kw, kb, fan_in, fan_out):
        bound = 1.0 / jnp.sqrt(fan_in)
        w = jax.random.uniform(kw, (fan_in, fan_out), jnp.float32, -bound, bound)
        b = jax.random.uniform(kb, (1, fan_out), jnp.float32, -bound, bound)
        return w, b

    w1, b1 = lin(ks[0], ks[1], d_in, hidden)
    w2, b2 = lin(ks[2], ks[3], hidden, hidden)
    w3, b3 = lin(ks[4], ks[5], hidden, 1)
    return (w1, b1, w2, b2, w3, b3)


def _reference(x, params):
    """Pure-JAX reference using the same bf16-operand / f32-accumulate math."""
    w1, b1, w2, b2, w3, b3 = params
    squeeze_batch = x.ndim == 1
    if squeeze_batch:
        x = x[None, :]
    bf = jnp.bfloat16
    h = jnp.dot(x.astype(bf), w1.astype(bf),
                preferred_element_type=jnp.float32) + b1
    h = jnp.maximum(h, 0.2 * h)
    h = jnp.dot(h.astype(bf), w2.astype(bf),
                preferred_element_type=jnp.float32) + b2
    h = jnp.maximum(h, 0.2 * h)
    o = jnp.dot(h.astype(bf), w3.astype(bf),
                preferred_element_type=jnp.float32) + b3
    o = o[:, 0]
    return o[0] if squeeze_batch else o


if __name__ == "__main__":
    key = jax.random.PRNGKey(0)
    k_x, k_x2, k_p = jax.random.split(key, 3)

    B, D_IN, HIDDEN = 8, 32, 32
    x = jax.random.normal(k_x, (B, D_IN), jnp.float32)
    raw_params = init_params(k_p, D_IN, HIDDEN)
    params = prepare_params(raw_params)           # one-time prep, off hot path

    # Batched path (B < TILE_B -> single partial tile).
    out = jax.block_until_ready(discriminator_forward(x, params))
    ref = _reference(x, raw_params)
    assert out.shape == (B,), out.shape
    assert jnp.allclose(out, ref, atol=2e-3, rtol=2e-3)

    # Un-batched (1-D input) path.
    out1 = jax.block_until_ready(discriminator_forward(x[0], params))
    ref1 = _reference(x[0], raw_params)
    assert out1.shape == (), out1.shape
    assert jnp.allclose(out1, ref1, atol=2e-3, rtol=2e-3)

    # Multi-tile batch with a ragged tail (exercises the grid + boundary path).
    B2 = 600
    x2 = jax.random.normal(k_x2, (B2, D_IN), jnp.float32)
    out2 = jax.block_until_ready(discriminator_forward(x2, params))
    ref2 = _reference(x2, raw_params)
    assert out2.shape == (B2,), out2.shape
    assert jnp.allclose(out2, ref2, atol=2e-3, rtol=2e-3)

    print("KERNEL_OK")
</pallas_src>

<mosaic_0001>
module attributes {stable_mosaic.version = 11 : i64} {
  func.func @_disc_kernel(%arg0: i32, %arg1: memref<256x32xf32, #tpu.memory_space<vmem>>, %arg2: memref<32x128xbf16, #tpu.memory_space<vmem>>, %arg3: memref<1x128xf32, #tpu.memory_space<vmem>>, %arg4: memref<128x128xbf16, #tpu.memory_space<vmem>>, %arg5: memref<1x128xf32, #tpu.memory_space<vmem>>, %arg6: memref<8x128xbf16, #tpu.memory_space<vmem>>, %arg7: memref<1x1xf32, #tpu.memory_space<vmem>>, %arg8: memref<1x256xf32, #tpu.memory_space<vmem>>) attributes {dimension_semantics = [#tpu.dimension_semantics<parallel>], iteration_bounds = array<i64: 1>, scalar_prefetch = 0 : i64, scratch_operands = 0 : i64, tpu.core_type = #tpu.core_type<tc>, window_params = [{transform_indices = @transform_0, window_bounds = array<i64: 256, 32>}, {pipeline_mode = #tpu.pipeline_mode<synchronous>, transform_indices = @transform_1, window_bounds = array<i64: 32, 128>}, {pipeline_mode = #tpu.pipeline_mode<synchronous>, transform_indices = @transform_2, window_bounds = array<i64: 1, 128>}, {pipeline_mode = #tpu.pipeline_mode<synchronous>, transform_indices = @transform_3, window_bounds = array<i64: 128, 128>}, {pipeline_mode = #tpu.pipeline_mode<synchronous>, transform_indices = @transform_4, window_bounds = array<i64: 1, 128>}, {pipeline_mode = #tpu.pipeline_mode<synchronous>, transform_indices = @transform_5, window_bounds = array<i64: 8, 128>}, {pipeline_mode = #tpu.pipeline_mode<synchronous>, transform_indices = @transform_6, window_bounds = array<i64: 1, 1>}, {transform_indices = @transform_7, window_bounds = array<i64: 1, 256>}]} {
    %c0 = arith.constant 0 : index
    %c0_0 = arith.constant 0 : index
    %0 = vector.load %arg1[%c0, %c0_0] : memref<256x32xf32, #tpu.memory_space<vmem>>, vector<256x32xf32>
    %1 = arith.truncf %0 : vector<256x32xf32> to vector<256x32xbf16>
    %c0_1 = arith.constant 0 : index
    %c0_2 = arith.constant 0 : index
    %2 = vector.load %arg2[%c0_1, %c0_2] : memref<32x128xbf16, #tpu.memory_space<vmem>>, vector<32x128xbf16>
    %cst = arith.constant dense<0.000000e+00> : vector<256x128xf32>
    %3 = tpu.matmul %1, %2, %cst {dimension_numbers = #tpu.dot_dimension_numbers<[1], [0], [0], [1], [0, 0, 1, 1], [], []>} : vector<256x32xbf16>, vector<32x128xbf16>, vector<256x128xf32> -> vector<256x128xf32>
    %c0_3 = arith.constant 0 : index
    %c0_4 = arith.constant 0 : index
    %4 = vector.load %arg3[%c0_3, %c0_4] : memref<1x128xf32, #tpu.memory_space<vmem>>, vector<1x128xf32>
    %5 = vector.broadcast %4 : vector<1x128xf32> to vector<256x128xf32>
    %6 = arith.addf %3, %5 : vector<256x128xf32>
    %cst_5 = arith.constant 2.000000e-01 : f32
    %7 = vector.broadcast %cst_5 : f32 to vector<256x128xf32>
    %8 = arith.mulf %7, %6 : vector<256x128xf32>
    %9 = arith.maximumf %6, %8 : vector<256x128xf32>
    %10 = arith.truncf %9 : vector<256x128xf32> to vector<256x128xbf16>
    %c0_6 = arith.constant 0 : index
    %c0_7 = arith.constant 0 : index
    %11 = vector.load %arg4[%c0_6, %c0_7] : memref<128x128xbf16, #tpu.memory_space<vmem>>, vector<128x128xbf16>
    %cst_8 = arith.constant dense<0.000000e+00> : vector<256x128xf32>
    %12 = tpu.matmul %10, %11, %cst_8 {dimension_numbers = #tpu.dot_dimension_numbers<[1], [0], [0], [1], [0, 0, 1, 1], [], []>} : vector<256x128xbf16>, vector<128x128xbf16>, vector<256x128xf32> -> vector<256x128xf32>
    %c0_9 = arith.constant 0 : index
    %c0_10 = arith.constant 0 : index
    %13 = vector.load %arg5[%c0_9, %c0_10] : memref<1x128xf32, #tpu.memory_space<vmem>>, vector<1x128xf32>
    %14 = vector.broadcast %13 : vector<1x128xf32> to vector<256x128xf32>
    %15 = arith.addf %12, %14 : vector<256x128xf32>
    %cst_11 = arith.constant 2.000000e-01 : f32
    %16 = vector.broadcast %cst_11 : f32 to vector<256x128xf32>
    %17 = arith.mulf %16, %15 : vector<256x128xf32>
    %18 = arith.maximumf %15, %17 : vector<256x128xf32>
    %c0_12 = arith.constant 0 : index
    %c0_13 = arith.constant 0 : index
    %19 = vector.load %arg6[%c0_12, %c0_13] : memref<8x128xbf16, #tpu.memory_space<vmem>>, vector<8x128xbf16>
    %20 = arith.truncf %18 : vector<256x128xf32> to vector<256x128xbf16>
    %cst_14 = arith.constant dense<0.000000e+00> : vector<8x256xf32>
    %21 = tpu.matmul %19, %20, %cst_14 {dimension_numbers = #tpu.dot_dimension_numbers<[1], [1], [0], [0], [0, 0, 1, 0], [], []>} : vector<8x128xbf16>, vector<256x128xbf16>, vector<8x256xf32> -> vector<8x256xf32>
    %c0_15 = arith.constant 0 : index
    %c0_16 = arith.constant 0 : index
    %22 = vector.load %arg7[%c0_15, %c0_16] : memref<1x1xf32, #tpu.memory_space<vmem>>, vector<1x1xf32>
    %23 = vector.broadcast %22 : vector<1x1xf32> to vector<8x256xf32>
    %24 = arith.addf %21, %23 : vector<8x256xf32>
    %25 = vector.extract_strided_slice %24 {offsets = [0, 0], sizes = [1, 256], strides = [1, 1]} : vector<8x256xf32> to vector<1x256xf32>
    %c0_17 = arith.constant 0 : index
    %c0_18 = arith.constant 0 : index
    %26 = vector.load %arg8[%c0_17, %c0_18] : memref<1x256xf32, #tpu.memory_space<vmem>>, vector<1x256xf32>
    tpu.vector_store %arg8[%c0_17, %c0_18], %25 {strides = array<i32>} : memref<1x256xf32, #tpu.memory_space<vmem>>, vector<1x256xf32>,
    return
  }
  func.func @transform_0(%arg0: i32) -> (i32, i32) {
    %c0_i32 = arith.constant 0 : i32
    %c0_i32_0 = arith.constant 0 : i32
    return %arg0, %c0_i32 : i32, i32
  }
  func.func @transform_1(%arg0: i32) -> (i32, i32) {
    %c0_i32 = arith.constant 0 : i32
    %c0_i32_0 = arith.constant 0 : i32
    %c0_i32_1 = arith.constant 0 : i32
    return %c0_i32, %c0_i32_0 : i32, i32
  }
  func.func @transform_2(%arg0: i32) -> (i32, i32) {
    %c0_i32 = arith.constant 0 : i32
    %c0_i32_0 = arith.constant 0 : i32
    %c0_i32_1 = arith.constant 0 : i32
    return %c0_i32, %c0_i32_0 : i32, i32
  }
  func.func @transform_3(%arg0: i32) -> (i32, i32) {
    %c0_i32 = arith.constant 0 : i32
    %c0_i32_0 = arith.constant 0 : i32
    %c0_i32_1 = arith.constant 0 : i32
    return %c0_i32, %c0_i32_0 : i32, i32
  }
  func.func @transform_4(%arg0: i32) -> (i32, i32) {
    %c0_i32 = arith.constant 0 : i32
    %c0_i32_0 = arith.constant 0 : i32
    %c0_i32_1 = arith.constant 0 : i32
    return %c0_i32, %c0_i32_0 : i32, i32
  }
  func.func @transform_5(%arg0: i32) -> (i32, i32) {
    %c0_i32 = arith.constant 0 : i32
    %c0_i32_0 = arith.constant 0 : i32
    %c0_i32_1 = arith.constant 0 : i32
    return %c0_i32, %c0_i32_0 : i32, i32
  }
  func.func @transform_6(%arg0: i32) -> (i32, i32) {
    %c0_i32 = arith.constant 0 : i32
    %c0_i32_0 = arith.constant 0 : i32
    %c0_i32_1 = arith.constant 0 : i32
    return %c0_i32, %c0_i32_0 : i32, i32
  }
  func.func @transform_7(%arg0: i32) -> (i32, i32) {
    %c0_i32 = arith.constant 0 : i32
    %c0_i32_0 = arith.constant 0 : i32
    return %c0_i32, %arg0 : i32, i32
  }
}

</mosaic_0001>

<bundles_post_ra>
// kernel: tpu_custom_call.1
= control target key start
LH: loop header
LB: loop body
LE: loop exit
PB: predicated region body
PF: predicated region fallthrough
CT: control target
= control target key end

     0   :  { %s1351_s0 = inlined_call_operand.hbm [shape: f32[8,32], index: 0, kind: input, shape index: {}]   ;;  %s1352_s1 = inlined_call_operand.hbm [shape: bf16[32,128], index: 1, kind: input, shape index: {}]   ;;  %s1353_s2 = inlined_call_operand.vmem [shape: f32[1,128], index: 2, kind: input, shape index: {}]   ;;  %s1354_s3 = inlined_call_operand.hbm [shape: bf16[128,128], index: 3, kind: input, shape index: {}]   ;;  %s1355_s4 = inlined_call_operand.vmem [shape: f32[1,128], index: 4, kind: input, shape index: {}]   ;;  %s1356_s5 = inlined_call_operand.vmem [shape: bf16[8,128], index: 5, kind: input, shape index: {}]   ;;  %s1357_s6 = inlined_call_operand.<no memory space> [shape: f32[1,1], index: 6, kind: input, shape index: {}]   ;;  %s1358_s7 = inlined_call_operand.hbm [shape: f32[1,256], index: 7, kind: output, shape index: {}]  }
   0x1   :  { %v12_v0 = vstv %s1357_s6 }
   0x2   :  { %13 = vst [vmem:[#allocation2] sm:$0x1] %v12_v0 }
   0x3   :  { %14 = vsyncpa [#allocation4], 0 }
   0x4   :  { %15 = vsyncpa [#allocation7], 0 }
   0x5   :  { %16 = vsyncpa [#allocation5], 0 }
   0x6   :  { %21 = vsyncadd [#allocation4], 3968  ;;  %s1123_s26 = smov [#allocation6]   ;;  %s1029_s30 = scalar_lea.hbm %s1352_s1, 256 }
   0x7   :  { %s34_s27 = sshll.u32 %s1123_s26, 4  ;;  %p1030_p0 = scmp.ne.s32.totalorder %s1352_s1, %s1029_s30  ;;  %s35_s27 = int_to_ptr.vmem [resolvable:$true] %s34_s27 }
   0x8   :  { %p1033_p1 = scmp.lt.u32.totalorder %s1029_s30, %s1352_s1 }
   0xa   :  { %p1035_p2 = pnand %p1033_p1, %p1030_p0 }
   0xc   :  { %1038 = shalt.err (!%p1035_p2)
}
   0xd   :  { %s1039_s6 = scalar_lea.vmem %s35_s27, 256  ;;  %p1044_p4 = scmp.lt.s32.totalorder %s35_s27, %s35_s27 }
   0xe   :  { %p1040_p3 = scmp.ne.s32.totalorder %s35_s27, %s1039_s6  ;;  %p1045_p5 = scmp.lt.s32.totalorder %s1039_s6, %s1039_s6 }
  0x10   :  { %p1046_p6 = por %p1045_p5, %p1044_p4 }
  0x12   :  { %p1047_p7 = pnand %p1046_p6, %p1040_p3 }
  0x14   :  { %1050 = shalt.err (!%p1047_p7)
}
  0x15   :  { %s1124_s12 = smov 64   ;;  %s1125_s13 = smov 4  }
  0x16   :  { %40 = dma.hbm_to_vmem [thread:$0]  %s1352_s1, 256, %s35_s27, [#allocation7], %s1124_s12, %s1124_s12, %s1125_s13  }
  0x17   :  { %s1126_s16 = smov [#allocation3]   ;;  %s1051_s20 = scalar_lea.hbm %s1351_s0, 128 }
  0x18   :  { %s22_s17 = sshll.u32 %s1126_s16, 4  ;;  %p1052_p8 = scmp.ne.s32.totalorder %s1351_s0, %s1051_s20  ;;  %s23_s17 = int_to_ptr.vmem [resolvable:$true] %s22_s17 }
  0x19   :  { %p1055_p9 = scmp.lt.u32.totalorder %s1051_s20, %s1351_s0 }
  0x1b   :  { %p1057_p10 = pnand %p1055_p9, %p1052_p8 }
  0x1d   :  { %1060 = shalt.err (!%p1057_p10)
}
  0x1e   :  { %s1061_s25 = scalar_lea.vmem %s23_s17, 128  ;;  %s1065_s1 = scalar_lea.vmem %s23_s17, 4096 }
  0x1f   :  { %p1062_p11 = scmp.ne.s32.totalorder %s23_s17, %s1061_s25  ;;  %p1066_p12 = scmp.lt.s32.totalorder %s23_s17, %s23_s17 }
  0x20   :  { %p1067_p13 = scmp.lt.s32.totalorder %s1065_s1, %s1061_s25 }
  0x22   :  { %p1068_p0 = por %p1067_p13, %p1066_p12 }
  0x24   :  { %p1069_p1 = pnand %p1068_p0, %p1062_p11 }
  0x26   :  { %1072 = shalt.err (!%p1069_p1)
}
  0x27   :  { %s1127_s26 = smov 128   ;;  %s1128_s27 = smov 8  }
  0x28   :  { %28 = dma.hbm_to_vmem [thread:$0]  %s1351_s0, 128, %s23_s17, [#allocation4], %s1127_s26, %s1127_s26, %s1128_s27  }
  0x29   :  { %s1129_s30 = smov [#allocation8]   ;;  %s1073_s11 = scalar_lea.hbm %s1354_s3, 1024 }
  0x2a   :  { %s48_s8 = sshll.u32 %s1129_s30, 4  ;;  %p1074_p2 = scmp.ne.s32.totalorder %s1354_s3, %s1073_s11  ;;  %s49_s8 = int_to_ptr.vmem [resolvable:$true] %s48_s8 }
  0x2b   :  { %p1077_p3 = scmp.lt.u32.totalorder %s1073_s11, %s1354_s3 }
  0x2d   :  { %p1079_p4 = pnand %p1077_p3, %p1074_p2 }
  0x2f   :  { %1082 = shalt.err (!%p1079_p4)
}
  0x30   :  { %s1083_s18 = scalar_lea.vmem %s49_s8, 1024  ;;  %p1088_p6 = scmp.lt.s32.totalorder %s49_s8, %s49_s8 }
  0x31   :  { %p1084_p5 = scmp.ne.s32.totalorder %s49_s8, %s1083_s18  ;;  %p1089_p7 = scmp.lt.s32.totalorder %s1083_s18, %s1083_s18 }
  0x33   :  { %p1090_p8 = por %p1089_p7, %p1088_p6 }
  0x35   :  { %p1091_p9 = pnand %p1090_p8, %p1084_p5 }
  0x37   :  { %1094 = shalt.err (!%p1091_p9)
}
  0x38   :  { %54 = dma.hbm_to_vmem [thread:$0]  %s1354_s3, 1024, %s49_s8, [#allocation7], %s1124_s12, %s1124_s12, %s1125_s13  }
  0x39   :  { %1117 = dma.done.wait [#allocation4], 4096  }
  0x3a   :  { %1118 = vsyncadd [#allocation4], 4294963200 }
  0x3b   :  { %1119 = dma.done.wait [#allocation7], 1280  }
  0x3c   :  { %1120 = vsyncadd [#allocation7], 4294966016  ;;  %v1019_v1 = vld [vmem:[#allocation6] sm:$0xff]   ;;  %v1020_v2 = vld [vmem:[#allocation6 + $0x8] sm:$0xff]   ;;  %vm142_vm0 = vcmask 261120  }
  0x3d   :  { %924 = vmatprep.subr.bf16.mxu0 %v1019_v1  ;;  %v71_v3 = vld [vmem:[#allocation3] sm:$0xff]  ;;  %v72_v4 = vld [vmem:[#allocation3 + $0x8] sm:$0xff]  ;;  %v73_v6 = vld [vmem:[#allocation3 + $0x10] sm:$0xff] }
  0x3e   :  { %925 = vmatpush3.bf16.msra.mxu0 %v1019_v1  ;;  %v103_v5 = vpack.c.bf16 %v72_v4, %v71_v3  ;;  %v74_v7 = vld [vmem:[#allocation3 + $0x18] sm:$0xff]  ;;  %v75_v8 = vld [vmem:[#allocation3 + $0x20] sm:$0xff]  ;;  %v76_v9 = vld [vmem:[#allocation3 + $0x28] sm:$0xff] }
  0x3f   :  { %926 = vmatprep.subr.bf16.mxu0 %v1020_v2  ;;  %v104_v10 = vpack.c.bf16 %v74_v7, %v73_v6  ;;  %v105_v11 = vpack.c.bf16 %v76_v9, %v75_v8  ;;  %v77_v12 = vld [vmem:[#allocation3 + $0x30] sm:$0xff]  ;;  %v78_v13 = vld [vmem:[#allocation3 + $0x38] sm:$0xff]  ;;  %v79_v14 = vld [vmem:[#allocation3 + $0x40] sm:$0xff] }
  0x40   :  { %928 = vmatprep.mubr.msk.bf16.mxu0 %vm142_vm0, %v103_v5  ;;  %v80_v15 = vld [vmem:[#allocation3 + $0x48] sm:$0xff]  ;;  %v1021_v16 = vld [vmem:[#allocation8] sm:$0xff]   ;;  %v106_v17 = vpack.c.bf16 %v78_v13, %v77_v12  ;;  %v1022_v18 = vld [vmem:[#allocation8 + $0x8] sm:$0xff]  }
  0x41   :  { %v107_v19 = vpack.c.bf16 %v80_v15, %v79_v14  ;;  %960 = vmatprep.subr.bf16.mxu1 %v1021_v16  ;;  %v81_v20 = vld [vmem:[#allocation3 + $0x50] sm:$0xff]  ;;  %v1023_v21 = vld [vmem:[#allocation8 + $0x10] sm:$0xff]   ;;  %v82_v22 = vld [vmem:[#allocation3 + $0x58] sm:$0xff] }
  0x42   :  { %927 = vmatpush3.bf16.msra.mxu0 %v1020_v2  ;;  %961 = vmatpush3.bf16.msra.mxu1 %v1021_v16  ;;  %v83_v23 = vld [vmem:[#allocation3 + $0x60] sm:$0xff]  ;;  %v84_v24 = vld [vmem:[#allocation3 + $0x68] sm:$0xff]  ;;  %v108_v26 = vpack.c.bf16 %v82_v22, %v81_v20  ;;  %v1025_v28 = vld [vmem:[#allocation8 + $0x20] sm:$0xff]  }
  0x43   :  { %962 = vmatprep.subr.bf16.mxu1 %v1022_v18  ;;  %v1024_v25 = vld [vmem:[#allocation8 + $0x18] sm:$0xff]   ;;  %v109_v27 = vpack.c.bf16 %v84_v24, %v83_v23  ;;  %v85_v29 = vld [vmem:[#allocation3 + $0x70] sm:$0xff]  ;;  %v86_v30 = vld [vmem:[#allocation3 + $0x78] sm:$0xff] }
  0x44   :  { %v87_v31 = vld [vmem:[#allocation3 + $0x80] sm:$0xff]  ;;  %v88_v32 = vld [vmem:[#allocation3 + $0x88] sm:$0xff]  ;;  %v110_v33 = vpack.c.bf16 %v86_v30, %v85_v29  ;;  %v89_v35 = vld [vmem:[#allocation3 + $0x90] sm:$0xff] }
  0x45   :  { %929 = vmatmul.mubr.msk.bf16.vlgmr.msra.gmra.mrb[0].mxu0 %vm142_vm0, %v104_v10  ;;  %v111_v34 = vpack.c.bf16 %v88_v32, %v87_v31  ;;  %v90_v36 = vld [vmem:[#allocation3 + $0x98] sm:$0xff]  ;;  %v91_v37 = vld [vmem:[#allocation3 + $0xa0] sm:$0xff]  ;;  %v92_v38 = vld [vmem:[#allocation3 + $0xa8] sm:$0xff] }
  0x46   :  { %932 = vmatprep.mubr.msk.bf16.mxu0 %vm142_vm0, %v105_v11  ;;  %963 = vmatpush3.bf16.msra.mxu1 %v1022_v18  ;;  %v112_v39 = vpack.c.bf16 %v90_v36, %v89_v35  ;;  %v113_v40 = vpack.c.bf16 %v92_v38, %v91_v37  ;;  %v93_v41 = vld [vmem:[#allocation3 + $0xb0] sm:$0xff]  ;;  %v94_v42 = vld [vmem:[#allocation3 + $0xb8] sm:$0xff]  ;;  %v95_v43 = vld [vmem:[#allocation3 + $0xc0] sm:$0xff] }
  0x47   :  { %964 = vmatprep.subr.bf16.mxu1 %v1023_v21  ;;  %v96_v44 = vld [vmem:[#allocation3 + $0xc8] sm:$0xff]  ;;  %v114_v45 = vpack.c.bf16 %v94_v42, %v93_v41  ;;  %v97_v47 = vld [vmem:[#allocation3 + $0xd0] sm:$0xff]  ;;  %v98_v48 = vld [vmem:[#allocation3 + $0xd8] sm:$0xff] }
  0x48   :  { %v115_v46 = vpack.c.bf16 %v96_v44, %v95_v43  ;;  %v99_v49 = vld [vmem:[#allocation3 + $0xe0] sm:$0xff]  ;;  %v100_v50 = vld [vmem:[#allocation3 + $0xe8] sm:$0xff]  ;;  %v116_v51 = vpack.c.bf16 %v98_v48, %v97_v47  ;;  %v101_v53 = vld [vmem:[#allocation3 + $0xf0] sm:$0xff] }
  0x49   :  { %v117_v52 = vpack.c.bf16 %v100_v50, %v99_v49  ;;  %v102_v54 = vld [vmem:[#allocation3 + $0xf8] sm:$0xff]  ;;  %v1027_v57 = vld [vmem:[#allocation8 + $0x30] sm:$0xff]   ;;  %v1028_v58 = vld [vmem:[#allocation8 + $0x38] sm:$0xff]  }
  0x4a   :  { %965 = vmatpush3.bf16.msra.mxu1 %v1023_v21  ;;  %v118_v55 = vpack.c.bf16 %v102_v54, %v101_v53  ;;  %v1026_v56 = vld [vmem:[#allocation8 + $0x28] sm:$0xff]  }
  0x4b   :  { %966 = vmatprep.subr.bf16.mxu1 %v1024_v25  ;;  %v1237_v59 = vld [vmem:[%s1353_s2] ss:$0 sm:$0xff] }
  0x4d   :  { %933 = vmatmul.mubr.msk.bf16.gmra.mrb[4].mxu0 %vm142_vm0, %v106_v17 }
  0x4e   :  { %936 = vmatprep.mubr.msk.bf16.mxu0 %vm142_vm0, %v107_v19  ;;  %967 = vmatpush3.bf16.msra.mxu1 %v1024_v25 }
  0x4f   :  { %968 = vmatprep.subr.bf16.mxu1 %v1025_v28 }
  0x52   :  { %969 = vmatpush3.bf16.msra.mxu1 %v1025_v28 }
  0x53   :  { %970 = vmatprep.subr.bf16.mxu1 %v1026_v56 }
  0x55   :  { %937 = vmatmul.mubr.msk.bf16.gmra.mrb[8].mxu0 %vm142_vm0, %v108_v26 }
  0x56   :  { %940 = vmatprep.mubr.msk.bf16.mxu0 %vm142_vm0, %v109_v27  ;;  %971 = vmatpush3.bf16.msra.mxu1 %v1026_v56 }
  0x57   :  { %972 = vmatprep.subr.bf16.mxu1 %v1027_v57 }
  0x5a   :  { %973 = vmatpush3.bf16.msra.mxu1 %v1027_v57 }
  0x5b   :  { %974 = vmatprep.subr.bf16.mxu1 %v1028_v58 }
  0x5d   :  { %941 = vmatmul.mubr.msk.bf16.gmra.mrb[12].mxu0 %vm142_vm0, %v110_v33 }
  0x5e   :  { %944 = vmatprep.mubr.msk.bf16.mxu0 %vm142_vm0, %v111_v34  ;;  %975 = vmatpush3.bf16.msra.mxu1 %v1028_v58 }
  0x65   :  { %945 = vmatmul.mubr.msk.bf16.gmra.mrb[16].mxu0 %vm142_vm0, %v112_v39 }
  0x66   :  { %948 = vmatprep.mubr.msk.bf16.mxu0 %vm142_vm0, %v113_v40 }
  0x6d   :  { %949 = vmatmul.mubr.msk.bf16.gmra.mrb[20].mxu0 %vm142_vm0, %v114_v45 }
  0x6e   :  { %952 = vmatprep.mubr.msk.bf16.mxu0 %vm142_vm0, %v115_v46 }
  0x75   :  { %953 = vmatmul.mubr.msk.bf16.gmra.mrb[24].mxu0 %vm142_vm0, %v116_v51 }
  0x76   :  { %956 = vmatprep.mubr.msk.bf16.mxu0 %vm142_vm0, %v117_v52 }
  0x7d   :  { %957 = vmatmul.mubr.msk.bf16.gmra.mrb[28].mxu0 %vm142_vm0, %v118_v55 }
 0x118   :  { %v930_v60 = vpop.f32.mrb[0].mxu0 }
 0x119   :  { %v234_v61 = vadd.f32 %v930_v60, %v1237_v59  ;;  %v225_v62 = vpop.f32.mrb[1].mxu0 }
 0x11a   :  { %v226_v63 = vadd.f32 %v1237_v59, %v225_v62  ;;  %v931_v0 = vpop.f32.mrb[2].mxu0 }
 0x11b   :  { %v354_v1 = vmul.f32 0.2, %v234_v61  ;;  %v237_v2 = vadd.f32 %v931_v0, %v1237_v59  ;;  %v228_v3 = vpop.f32.mrb[3].mxu0 }
 0x11c   :  { %v352_v4 = vmul.f32 0.2, %v226_v63  ;;  %v229_v5 = vadd.f32 %v1237_v59, %v228_v3 }
 0x11d   :  { %v355_v6 = vmul.f32 0.2, %v237_v2  ;;  %v386_v8 = vmax.f32 %v234_v61, %v354_v1 }
 0x11e   :  { %v353_v7 = vmul.f32 0.2, %v229_v5  ;;  %v384_v11 = vmax.f32 %v226_v63, %v352_v4 }
 0x11f   :  { %v387_v9 = vmax.f32 %v237_v2, %v355_v6 }
 0x120   :  { %v934_v10 = vpop.f32.mrb[4].mxu0  ;;  %v385_v12 = vmax.f32 %v229_v5, %v353_v7 }
 0x121   :  { %v250_v13 = vadd.f32 %v934_v10, %v1237_v59  ;;  %v241_v14 = vpop.f32.mrb[5].mxu0  ;;  %v417_v15 = vpack.c.bf16 %v387_v9, %v386_v8 }
 0x122   :  { %v242_v16 = vadd.f32 %v1237_v59, %v241_v14  ;;  %v935_v17 = vpop.f32.mrb[6].mxu0  ;;  %v416_v18 = vpack.c.bf16 %v385_v12, %v384_v11 }
 0x123   :  { %v358_v19 = vmul.f32 0.2, %v250_v13  ;;  %v253_v20 = vadd.f32 %v935_v17, %v1237_v59  ;;  %v244_v21 = vpop.f32.mrb[7].mxu0 }
 0x124   :  { %v356_v22 = vmul.f32 0.2, %v242_v16  ;;  %v245_v23 = vadd.f32 %v1237_v59, %v244_v21  ;;  %976 = vmatprep.mubr.bf16.mxu1 %v416_v18 }
 0x125   :  { %v359_v24 = vmul.f32 0.2, %v253_v20  ;;  %977 = vmatmul.mubr.bf16.vlgmr.msra.gmra.mrb[0].mxu1 %v417_v15  ;;  %v390_v26 = vmax.f32 %v250_v13, %v358_v19 }
 0x126   :  { %v357_v25 = vmul.f32 0.2, %v245_v23  ;;  %v388_v28 = vmax.f32 %v242_v16, %v356_v22 }
 0x127   :  { %v391_v27 = vmax.f32 %v253_v20, %v359_v24 }
 0x128   :  { %v389_v29 = vmax.f32 %v245_v23, %v357_v25  ;;  %v938_v30 = vpop.f32.mrb[8].mxu0 }
 0x129   :  { %v266_v31 = vadd.f32 %v938_v30, %v1237_v59  ;;  %v257_v32 = vpop.f32.mrb[9].mxu0  ;;  %v419_v33 = vpack.c.bf16 %v391_v27, %v390_v26 }
 0x12a   :  { %v258_v34 = vadd.f32 %v1237_v59, %v257_v32  ;;  %v939_v35 = vpop.f32.mrb[10].mxu0  ;;  %v418_v36 = vpack.c.bf16 %v389_v29, %v388_v28 }
 0x12b   :  { %v362_v37 = vmul.f32 0.2, %v266_v31  ;;  %v269_v38 = vadd.f32 %v939_v35, %v1237_v59  ;;  %v260_v39 = vpop.f32.mrb[11].mxu0 }
 0x12c   :  { %v360_v40 = vmul.f32 0.2, %v258_v34  ;;  %v261_v41 = vadd.f32 %v1237_v59, %v260_v39  ;;  %980 = vmatprep.mubr.bf16.mxu1 %v418_v36 }
 0x12d   :  { %v363_v42 = vmul.f32 0.2, %v269_v38  ;;  %981 = vmatmul.mubr.bf16.gmra.mrb[4].mxu1 %v419_v33  ;;  %v394_v44 = vmax.f32 %v266_v31, %v362_v37 }
 0x12e   :  { %v361_v43 = vmul.f32 0.2, %v261_v41  ;;  %v392_v46 = vmax.f32 %v258_v34, %v360_v40 }
 0x12f   :  { %v395_v45 = vmax.f32 %v269_v38, %v363_v42 }
 0x130   :  { %v393_v47 = vmax.f32 %v261_v41, %v361_v43  ;;  %v942_v48 = vpop.f32.mrb[12].mxu0 }
 0x131   :  { %v282_v49 = vadd.f32 %v942_v48, %v1237_v59  ;;  %v273_v50 = vpop.f32.mrb[13].mxu0  ;;  %v421_v51 = vpack.c.bf16 %v395_v45, %v394_v44 }
 0x132   :  { %v274_v52 = vadd.f32 %v1237_v59, %v273_v50  ;;  %v943_v53 = vpop.f32.mrb[14].mxu0  ;;  %v420_v54 = vpack.c.bf16 %v393_v47, %v392_v46 }
 0x133   :  { %v366_v55 = vmul.f32 0.2, %v282_v49  ;;  %v285_v56 = vadd.f32 %v943_v53, %v1237_v59  ;;  %v276_v57 = vpop.f32.mrb[15].mxu0 }
 0x134   :  { %v364_v58 = vmul.f32 0.2, %v274_v52  ;;  %v277_v60 = vadd.f32 %v1237_v59, %v276_v57  ;;  %984 = vmatprep.mubr.bf16.mxu1 %v420_v54 }
 0x135   :  { %v367_v61 = vmul.f32 0.2, %v285_v56  ;;  %985 = vmatmul.mubr.bf16.gmra.mrb[8].mxu1 %v421_v51  ;;  %v398_v63 = vmax.f32 %v282_v49, %v366_v55 }
 0x136   :  { %v365_v62 = vmul.f32 0.2, %v277_v60  ;;  %v396_v1 = vmax.f32 %v274_v52, %v364_v58 }
 0x137   :  { %v399_v0 = vmax.f32 %v285_v56, %v367_v61 }
 0x138   :  { %v397_v2 = vmax.f32 %v277_v60, %v365_v62  ;;  %v946_v3 = vpop.f32.mrb[16].mxu0 }
 0x139   :  { %v298_v4 = vadd.f32 %v946_v3, %v1237_v59  ;;  %v289_v5 = vpop.f32.mrb[17].mxu0  ;;  %v423_v6 = vpack.c.bf16 %v399_v0, %v398_v63 }
 0x13a   :  { %v290_v7 = vadd.f32 %v1237_v59, %v289_v5  ;;  %v947_v8 = vpop.f32.mrb[18].mxu0  ;;  %v422_v9 = vpack.c.bf16 %v397_v2, %v396_v1 }
 0x13b   :  { %v370_v10 = vmul.f32 0.2, %v298_v4  ;;  %v301_v11 = vadd.f32 %v947_v8, %v1237_v59  ;;  %v292_v12 = vpop.f32.mrb[19].mxu0 }
 0x13c   :  { %v368_v13 = vmul.f32 0.2, %v290_v7  ;;  %v293_v14 = vadd.f32 %v1237_v59, %v292_v12  ;;  %988 = vmatprep.mubr.bf16.mxu1 %v422_v9 }
 0x13d   :  { %v371_v15 = vmul.f32 0.2, %v301_v11  ;;  %989 = vmatmul.mubr.bf16.gmra.mrb[12].mxu1 %v423_v6  ;;  %v402_v17 = vmax.f32 %v298_v4, %v370_v10 }
 0x13e   :  { %v369_v16 = vmul.f32 0.2, %v293_v14  ;;  %v400_v19 = vmax.f32 %v290_v7, %v368_v13 }
 0x13f   :  { %v403_v18 = vmax.f32 %v301_v11, %v371_v15  ;;  %v863_v15 = vld [vmem:[#allocation2] ss:$0 sm:$0xff] }
 0x140   :  { %v401_v20 = vmax.f32 %v293_v14, %v369_v16  ;;  %v950_v21 = vpop.f32.mrb[20].mxu0  ;;  %v1274_v14 = vld [vmem:[%s1356_s5] sm:$0xf] }
 0x141   :  { %v314_v22 = vadd.f32 %v950_v21, %v1237_v59  ;;  %v305_v23 = vpop.f32.mrb[21].mxu0  ;;  %v425_v24 = vpack.c.bf16 %v403_v18, %v402_v17  ;;  %922 = vmatprep.mubr.bf16.mxu0 %v1274_v14  ;;  %v1280_v16 = vld [vmem:[%s1355_s4] ss:$0 sm:$0xff]  ;;  %s1132_s4 = smov [#allocation9]  }
 0x142   :  { %v306_v25 = vadd.f32 %v1237_v59, %v305_v23  ;;  %v951_v26 = vpop.f32.mrb[22].mxu0  ;;  %v424_v27 = vpack.c.bf16 %v401_v20, %v400_v19  ;;  %s825_s5 = sshll.u32 %s1132_s4, 4  ;;  %s826_s5 = int_to_ptr.vmem [resolvable:$true] %s825_s5 }
 0x143   :  { %v374_v28 = vmul.f32 0.2, %v314_v22  ;;  %v317_v29 = vadd.f32 %v951_v26, %v1237_v59  ;;  %v308_v30 = vpop.f32.mrb[23].mxu0  ;;  %s1095_s21 = scalar_lea.vmem %s826_s5, 32  ;;  %p1100_p11 = scmp.lt.s32.totalorder %s826_s5, %s826_s5 }
 0x144   :  { %v372_v31 = vmul.f32 0.2, %v306_v25  ;;  %v309_v32 = vadd.f32 %v1237_v59, %v308_v30  ;;  %992 = vmatprep.mubr.bf16.mxu1 %v424_v27  ;;  %p1096_p10 = scmp.ne.s32.totalorder %s826_s5, %s1095_s21  ;;  %p1101_p12 = scmp.lt.s32.totalorder %s1095_s21, %s1095_s21 }
 0x145   :  { %v406_v33 = vmax.f32 %v314_v22, %v374_v28  ;;  %v375_v34 = vmul.f32 0.2, %v317_v29  ;;  %993 = vmatmul.mubr.bf16.gmra.mrb[16].mxu1 %v425_v24 }
 0x146   :  { %v404_v35 = vmax.f32 %v306_v25, %v372_v31  ;;  %v373_v36 = vmul.f32 0.2, %v309_v32  ;;  %p1102_p13 = por %p1101_p12, %p1100_p11 }
 0x147   :  { %v407_v37 = vmax.f32 %v317_v29, %v375_v34 }
 0x148   :  { %v405_v38 = vmax.f32 %v309_v32, %v373_v36  ;;  %v954_v39 = vpop.f32.mrb[24].mxu0  ;;  %p1103_p0 = pnand %p1102_p13, %p1096_p10 }
 0x149   :  { %v330_v40 = vadd.f32 %v954_v39, %v1237_v59  ;;  %v427_v41 = vpack.c.bf16 %v407_v37, %v406_v33  ;;  %v321_v42 = vpop.f32.mrb[25].mxu0 }
 0x14a   :  { %v426_v43 = vpack.c.bf16 %v405_v38, %v404_v35  ;;  %v322_v44 = vadd.f32 %v1237_v59, %v321_v42  ;;  %v955_v45 = vpop.f32.mrb[26].mxu0 }
 0x14b   :  { %v378_v46 = vmul.f32 0.2, %v330_v40  ;;  %v333_v47 = vadd.f32 %v955_v45, %v1237_v59  ;;  %v324_v48 = vpop.f32.mrb[27].mxu0 }
 0x14c   :  { %996 = vmatprep.mubr.bf16.mxu1 %v426_v43  ;;  %v376_v49 = vmul.f32 0.2, %v322_v44  ;;  %v325_v50 = vadd.f32 %v1237_v59, %v324_v48 }
 0x14d   :  { %v410_v51 = vmax.f32 %v330_v40, %v378_v46  ;;  %997 = vmatmul.mubr.bf16.gmra.mrb[20].mxu1 %v427_v41  ;;  %v379_v52 = vmul.f32 0.2, %v333_v47 }
 0x14e   :  { %v408_v53 = vmax.f32 %v322_v44, %v376_v49  ;;  %v377_v54 = vmul.f32 0.2, %v325_v50 }
 0x14f   :  { %v411_v55 = vmax.f32 %v333_v47, %v379_v52 }
 0x150   :  { %v409_v56 = vmax.f32 %v325_v50, %v377_v54  ;;  %v958_v57 = vpop.f32.mrb[28].mxu0 }
 0x151   :  { %v429_v58 = vpack.c.bf16 %v411_v55, %v410_v51  ;;  %v346_v60 = vadd.f32 %v958_v57, %v1237_v59  ;;  %v337_v61 = vpop.f32.mrb[29].mxu0 }
 0x152   :  { %v428_v62 = vpack.c.bf16 %v409_v56, %v408_v53  ;;  %v338_v63 = vadd.f32 %v1237_v59, %v337_v61  ;;  %v959_v0 = vpop.f32.mrb[30].mxu0 }
 0x153   :  { %v382_v1 = vmul.f32 0.2, %v346_v60  ;;  %v349_v2 = vadd.f32 %v959_v0, %v1237_v59  ;;  %v340_v3 = vpop.f32.mrb[31].mxu0 }
 0x154   :  { %1000 = vmatprep.mubr.bf16.mxu1 %v428_v62  ;;  %v380_v4 = vmul.f32 0.2, %v338_v63  ;;  %v341_v5 = vadd.f32 %v1237_v59, %v340_v3  ;;  %v1130_v59 = vmov 0  }
 0x155   :  { %1001 = vmatmul.mubr.bf16.gmra.mrb[24].mxu1 %v429_v58  ;;  %v414_v6 = vmax.f32 %v346_v60, %v382_v1  ;;  %v383_v7 = vmul.f32 0.2, %v349_v2  ;;  %1018 = vset.pattern.permute.xlu0 %v1130_v59 }
 0x156   :  { %v412_v8 = vmax.f32 %v338_v63, %v380_v4  ;;  %v381_v9 = vmul.f32 0.2, %v341_v5  ;;  %752 = vperm.xlu0 %1018, %v863_v15  }
 0x157   :  { %v415_v10 = vmax.f32 %v349_v2, %v383_v7 }
 0x158   :  { %v413_v11 = vmax.f32 %v341_v5, %v381_v9 }
 0x159   :  { %v431_v12 = vpack.c.bf16 %v415_v10, %v414_v6 }
 0x15a   :  { %v430_v13 = vpack.c.bf16 %v413_v11, %v412_v8 }
 0x15c   :  { %1004 = vmatprep.mubr.bf16.mxu1 %v430_v13 }
 0x15d   :  { %1005 = vmatmul.mubr.bf16.gmra.mrb[28].mxu1 %v431_v12 }
 0x1f8   :  { %v978_v17 = vpop.f32.mrb[0].mxu1 }
 0x1f9   :  { %v546_v18 = vadd.f32 %v978_v17, %v1280_v16  ;;  %v537_v19 = vpop.f32.mrb[1].mxu1 }
 0x1fa   :  { %v538_v20 = vadd.f32 %v1280_v16, %v537_v19  ;;  %v979_v21 = vpop.f32.mrb[2].mxu1 }
 0x1fb   :  { %v666_v22 = vmul.f32 0.2, %v546_v18  ;;  %v549_v23 = vadd.f32 %v979_v21, %v1280_v16  ;;  %v540_v24 = vpop.f32.mrb[3].mxu1 }
 0x1fc   :  { %v664_v25 = vmul.f32 0.2, %v538_v20  ;;  %v541_v26 = vadd.f32 %v1280_v16, %v540_v24 }
 0x1fd   :  { %v667_v27 = vmul.f32 0.2, %v549_v23  ;;  %v698_v29 = vmax.f32 %v546_v18, %v666_v22 }
 0x1fe   :  { %v665_v28 = vmul.f32 0.2, %v541_v26  ;;  %v696_v31 = vmax.f32 %v538_v20, %v664_v25 }
 0x1ff   :  { %v699_v30 = vmax.f32 %v549_v23, %v667_v27 }
 0x200   :  { %v697_v32 = vmax.f32 %v541_v26, %v665_v28  ;;  %v982_v33 = vpop.f32.mrb[4].mxu1 }
 0x201   :  { %v1286_v34 = vpack.c.bf16 %v699_v30, %v698_v29  ;;  %v562_v35 = vadd.f32 %v982_v33, %v1280_v16  ;;  %v553_v36 = vpop.f32.mrb[5].mxu1 }
 0x202   :  { %v1289_v37 = vpack.c.bf16 %v697_v32, %v696_v31  ;;  %v554_v38 = vadd.f32 %v1280_v16, %v553_v36  ;;  %v983_v39 = vpop.f32.mrb[6].mxu1 }
 0x203   :  { %v670_v40 = vmul.f32 0.2, %v562_v35  ;;  %v565_v41 = vadd.f32 %v983_v39, %v1280_v16  ;;  %v556_v42 = vpop.f32.mrb[7].mxu1 }
 0x204   :  { %v668_v43 = vmul.f32 0.2, %v554_v38  ;;  %v557_v44 = vadd.f32 %v1280_v16, %v556_v42 }
 0x205   :  { %v671_v45 = vmul.f32 0.2, %v565_v41  ;;  %v702_v47 = vmax.f32 %v562_v35, %v670_v40 }
 0x206   :  { %v669_v46 = vmul.f32 0.2, %v557_v44  ;;  %v700_v49 = vmax.f32 %v554_v38, %v668_v43 }
 0x207   :  { %v703_v48 = vmax.f32 %v565_v41, %v671_v45 }
 0x208   :  { %v701_v50 = vmax.f32 %v557_v44, %v669_v46  ;;  %v986_v51 = vpop.f32.mrb[8].mxu1 }
 0x209   :  { %v1294_v52 = vpack.c.bf16 %v703_v48, %v702_v47  ;;  %v578_v53 = vadd.f32 %v986_v51, %v1280_v16  ;;  %v569_v54 = vpop.f32.mrb[9].mxu1 }
 0x20a   :  { %v1297_v55 = vpack.c.bf16 %v701_v50, %v700_v49  ;;  %v570_v56 = vadd.f32 %v1280_v16, %v569_v54  ;;  %v987_v57 = vpop.f32.mrb[10].mxu1 }
 0x20b   :  { %v674_v58 = vmul.f32 0.2, %v578_v53  ;;  %v581_v60 = vadd.f32 %v987_v57, %v1280_v16  ;;  %v572_v61 = vpop.f32.mrb[11].mxu1 }
 0x20c   :  { %v672_v62 = vmul.f32 0.2, %v570_v56  ;;  %v573_v63 = vadd.f32 %v1280_v16, %v572_v61 }
 0x20d   :  { %v675_v0 = vmul.f32 0.2, %v581_v60  ;;  %v706_v2 = vmax.f32 %v578_v53, %v674_v58 }
 0x20e   :  { %v673_v1 = vmul.f32 0.2, %v573_v63  ;;  %v704_v4 = vmax.f32 %v570_v56, %v672_v62 }
 0x20f   :  { %v707_v3 = vmax.f32 %v581_v60, %v675_v0 }
 0x210   :  { %v705_v5 = vmax.f32 %v573_v63, %v673_v1  ;;  %v990_v6 = vpop.f32.mrb[12].mxu1 }
 0x211   :  { %v1302_v7 = vpack.c.bf16 %v707_v3, %v706_v2  ;;  %v594_v8 = vadd.f32 %v990_v6, %v1280_v16  ;;  %v585_v9 = vpop.f32.mrb[13].mxu1 }
 0x212   :  { %v1305_v10 = vpack.c.bf16 %v705_v5, %v704_v4  ;;  %v586_v11 = vadd.f32 %v1280_v16, %v585_v9  ;;  %v991_v12 = vpop.f32.mrb[14].mxu1 }
 0x213   :  { %v678_v13 = vmul.f32 0.2, %v594_v8  ;;  %v597_v15 = vadd.f32 %v991_v12, %v1280_v16  ;;  %v588_v59 = vpop.f32.mrb[15].mxu1 }
 0x214   :  { %v676_v17 = vmul.f32 0.2, %v586_v11  ;;  %v589_v18 = vadd.f32 %v1280_v16, %v588_v59 }
 0x215   :  { %v679_v19 = vmul.f32 0.2, %v597_v15  ;;  %v710_v21 = vmax.f32 %v594_v8, %v678_v13 }
 0x216   :  { %v677_v20 = vmul.f32 0.2, %v589_v18  ;;  %v708_v23 = vmax.f32 %v586_v11, %v676_v17 }
 0x217   :  { %v711_v22 = vmax.f32 %v597_v15, %v679_v19 }
 0x218   :  { %v709_v24 = vmax.f32 %v589_v18, %v677_v20  ;;  %v994_v25 = vpop.f32.mrb[16].mxu1 }
 0x219   :  { %v1310_v26 = vpack.c.bf16 %v711_v22, %v710_v21  ;;  %v610_v27 = vadd.f32 %v994_v25, %v1280_v16  ;;  %v601_v28 = vpop.f32.mrb[17].mxu1 }
 0x21a   :  { %v1313_v29 = vpack.c.bf16 %v709_v24, %v708_v23  ;;  %v602_v30 = vadd.f32 %v1280_v16, %v601_v28  ;;  %v995_v31 = vpop.f32.mrb[18].mxu1 }
 0x21b   :  { %v682_v32 = vmul.f32 0.2, %v610_v27  ;;  %v613_v33 = vadd.f32 %v995_v31, %v1280_v16  ;;  %v604_v35 = vpop.f32.mrb[19].mxu1 }
 0x21c   :  { %v680_v36 = vmul.f32 0.2, %v602_v30  ;;  %v605_v38 = vadd.f32 %v1280_v16, %v604_v35 }
 0x21d   :  { %v683_v39 = vmul.f32 0.2, %v613_v33  ;;  %v714_v41 = vmax.f32 %v610_v27, %v682_v32 }
 0x21e   :  { %v681_v40 = vmul.f32 0.2, %v605_v38  ;;  %v712_v43 = vmax.f32 %v602_v30, %v680_v36 }
 0x21f   :  { %v715_v42 = vmax.f32 %v613_v33, %v683_v39 }
 0x220   :  { %v713_v44 = vmax.f32 %v605_v38, %v681_v40  ;;  %v998_v45 = vpop.f32.mrb[20].mxu1 }
 0x221   :  { %v626_v46 = vadd.f32 %v998_v45, %v1280_v16  ;;  %v617_v47 = vpop.f32.mrb[21].mxu1  ;;  %v738_v48 = vpack.c.bf16 %v715_v42, %v714_v41  ;;  %v802_v45 = vlaneseq }
 0x222   :  { %v618_v49 = vadd.f32 %v1280_v16, %v617_v47  ;;  %v999_v50 = vpop.f32.mrb[22].mxu1  ;;  %v737_v51 = vpack.c.bf16 %v713_v44, %v712_v43 }
 0x223   :  { %v686_v53 = vmul.f32 0.2, %v626_v46  ;;  %v629_v54 = vadd.f32 %v999_v50, %v1280_v16  ;;  %v620_v56 = vpop.f32.mrb[23].mxu1  ;;  %vm816_vm1 = vcmp.lt.s32.totalorder %v802_v45, 256 }
 0x224   :  { %v684_v57 = vmul.f32 0.2, %v618_v49  ;;  %v621_v58 = vadd.f32 %v1280_v16, %v620_v56  ;;  %906 = vmatprep.subr.bf16.mxu0 %v737_v51 }
 0x225   :  { %v687_v60 = vmul.f32 0.2, %v629_v54  ;;  %907 = vmatpush3.bf16.xpose.msra.mxu0 %v1289_v37  ;;  %v718_v62 = vmax.f32 %v626_v46, %v686_v53  ;;  %v753_v46 = vpop.permute.xlu0 %752 }
 0x226   :  { %v685_v61 = vmul.f32 0.2, %v621_v58  ;;  %908 = vmatprep.subr.bf16.mxu0 %v738_v48  ;;  %v716_v0 = vmax.f32 %v618_v49, %v684_v57 }
 0x227   :  { %v719_v63 = vmax.f32 %v629_v54, %v687_v60 }
 0x228   :  { %v717_v1 = vmax.f32 %v621_v58, %v685_v61  ;;  %v1002_v2 = vpop.f32.mrb[24].mxu1 }
 0x229   :  { %v642_v3 = vadd.f32 %v1002_v2, %v1280_v16  ;;  %v633_v4 = vpop.f32.mrb[25].mxu1  ;;  %v740_v5 = vpack.c.bf16 %v719_v63, %v718_v62 }
 0x22a   :  { %v634_v6 = vadd.f32 %v1280_v16, %v633_v4  ;;  %v739_v8 = vpack.c.bf16 %v717_v1, %v716_v0  ;;  %v1003_v9 = vpop.f32.mrb[26].mxu1 }
 0x22b   :  { %v690_v11 = vmul.f32 0.2, %v642_v3  ;;  %v645_v12 = vadd.f32 %v1003_v9, %v1280_v16  ;;  %v636_v13 = vpop.f32.mrb[27].mxu1 }
 0x22c   :  { %v688_v37 = vmul.f32 0.2, %v634_v6  ;;  %v637_v15 = vadd.f32 %v1280_v16, %v636_v13 }
 0x22d   :  { %v722_v59 = vmax.f32 %v642_v3, %v690_v11  ;;  %909 = vmatpush3.bf16.xpose.msra.mxu0 %v1286_v34  ;;  %v691_v17 = vmul.f32 0.2, %v645_v12 }
 0x22e   :  { %v720_v18 = vmax.f32 %v634_v6, %v688_v37  ;;  %910 = vmatprep.subr.bf16.mxu0 %v739_v8  ;;  %v689_v19 = vmul.f32 0.2, %v637_v15 }
 0x22f   :  { %v723_v20 = vmax.f32 %v645_v12, %v691_v17 }
 0x230   :  { %v721_v21 = vmax.f32 %v637_v15, %v689_v19  ;;  %v1006_v22 = vpop.f32.mrb[28].mxu1 }
 0x231   :  { %v658_v23 = vadd.f32 %v1006_v22, %v1280_v16  ;;  %v649_v24 = vpop.f32.mrb[29].mxu1  ;;  %v742_v25 = vpack.c.bf16 %v723_v20, %v722_v59 }
 0x232   :  { %v650_v27 = vadd.f32 %v1280_v16, %v649_v24  ;;  %v741_v28 = vpack.c.bf16 %v721_v21, %v720_v18  ;;  %v1007_v30 = vpop.f32.mrb[30].mxu1 }
 0x233   :  { %v694_v31 = vmul.f32 0.2, %v658_v23  ;;  %v661_v32 = vadd.f32 %v1007_v30, %v1280_v16  ;;  %v652_v33 = vpop.f32.mrb[31].mxu1 }
 0x234   :  { %v692_v34 = vmul.f32 0.2, %v650_v27  ;;  %v653_v35 = vadd.f32 %v1280_v16, %v652_v33  ;;  %v1131_v16 = vmov 1966171168  }
 0x235   :  { %911 = vmatpush3.bf16.xpose.msra.mxu0 %v1297_v55  ;;  %v726_v36 = vmax.f32 %v658_v23, %v694_v31  ;;  %v695_v38 = vmul.f32 0.2, %v661_v32  ;;  %v800_v55 = vunpack.c.l.s4 %v1131_v16 }
 0x236   :  { %912 = vmatprep.subr.bf16.mxu0 %v740_v5  ;;  %v724_v39 = vmax.f32 %v650_v27, %v692_v34  ;;  %v693_v40 = vmul.f32 0.2, %v653_v35 }
 0x237   :  { %v727_v41 = vmax.f32 %v661_v32, %v695_v38  ;;  %v801_v47 = vunpack.c.0.s8 %v800_v55 }
 0x238   :  { %v725_v42 = vmax.f32 %v653_v35, %v693_v40 }
 0x239   :  { %v744_v43 = vpack.c.bf16 %v727_v41, %v726_v36 }
 0x23a   :  { %v743_v44 = vpack.c.bf16 %v725_v42, %v724_v39 }
 0x23d   :  { %913 = vmatpush3.bf16.xpose.msra.mxu0 %v1294_v52  ;;  %v803_v52 = vshrl.u32 %v802_v45, 7 }
 0x23e   :  { %914 = vmatprep.subr.bf16.mxu0 %v741_v28 }
 0x23f   :  { %v804_v51 = vsub.s32 %v801_v47, %v803_v52 }
 0x245   :  { %915 = vmatpush3.bf16.xpose.msra.mxu0 %v1305_v10 }
 0x246   :  { %916 = vmatprep.subr.bf16.mxu0 %v742_v25 }
 0x24d   :  { %917 = vmatpush3.bf16.xpose.msra.mxu0 %v1302_v7 }
 0x24e   :  { %918 = vmatprep.subr.bf16.mxu0 %v743_v44 }
 0x255   :  { %919 = vmatpush3.bf16.xpose.msra.mxu0 %v1313_v29 }
 0x256   :  { %920 = vmatprep.subr.bf16.mxu0 %v744_v43 }
 0x25d   :  { %921 = vmatpush3.bf16.xpose.msra.mxu0 %v1310_v26 }
 0x264   :  { %923 = vmatmul.mubr.bf16.vlgmr.msra.gmra.mrb[32].mxu0 %v1274_v14 }
 0x337   :  { %v789_v48 = vpop.f32.mrb[32].mxu0 }
 0x338   :  { %v790_v49 = vadd.f32 %v789_v48, %v753_v46  ;;  %v791_v10 = vpop.f32.mrb[33].mxu0 }
 0x339   :  { %v792_v50 = vadd.f32 %v791_v10, %v753_v46  ;;  %v793_v7 = vpop.f32.mrb[34].mxu0 }
 0x33a   :  { %v794_v53 = vpop.f32.mrb[35].mxu0 }
 0x33b   :  { %v798_v54 = vcombine.low %v790_v49, %v792_v50 }
 0x33d   :  { %v805_v29 = vrot.slane %v798_v54, %v804_v51 }
 0x33f   :  { %v812_v26 = vrot.slane %v805_v29, %v804_v51 }
 0x341   :  { %818 = vst.msk [vmem:[#allocation9] sm:$0x3] %vm816_vm1, %v812_v26 }
 0x342   :  { %1106 = shalt.err (!%p1103_p0)
}
 0x343   :  { %s1107_s24 = scalar_lea.hbm %s1358_s7, 32 }
 0x344   :  { %p1108_p1 = scmp.ne.s32.totalorder %s1358_s7, %s1107_s24  ;;  %p1111_p2 = scmp.lt.u32.totalorder %s1107_s24, %s1358_s7 }
 0x346   :  { %p1113_p3 = pnand %p1111_p2, %p1108_p1 }
 0x348   :  { %1116 = shalt.err (!%p1113_p3)
}
 0x349   :  { %828 = dma.vmem_to_hbm [thread:$0]  %s826_s5, 32, %s1358_s7, [#allocation5]  }
 0x34a   :  { %1121 = dma.done.wait [#allocation5], 32  }
 0x34b   :  { %1122 = vsyncadd [#allocation5], 4294967264 }
 0x34c   :  { %832 = vsyncpa [#allocation4], 1 }
 0x34d   :  { %833 = vsyncpa [#allocation7], 1 }
 0x34e   :  { %834 = vsyncpa [#allocation5], 1 }

</bundles_post_ra>
